<compile_context>
chip_gen: v7x
topology: tpu7x:2x2x1
jax: 0.10.0
libtpu: 0.0.40
codegen_flags: <defaults>
</compile_context>

<pallas_src>
import functools

import jax
import jax.numpy as jnp
from jax.experimental import pallas as pl
from jax.experimental.pallas import tpu as pltpu


def _round_up(x: int, m: int) -> int:
    return ((x + m - 1) // m) * m


def _batch_tiling(batch: int, block_batch: int):
    """Pick (batch_tile, grid) for the batch axis.

    * batch < 256: single tile covering the whole batch (block dims == full
      array dims, so no (8,128) alignment requirement and no edge blocks).
    * batch >= 256: tile is a multiple of 128 (it becomes the lane dim of the
      transposed compact output), at least 2 tiles so both v7x TensorCores get
      work, capped at block_batch rows.
    """
    if batch < 256:
        return batch, 1
    tb = min(_round_up(block_batch, 128), _round_up(pl.cdiv(batch, 2), 128))
    return tb, pl.cdiv(batch, tb)


# ----------------------------- Pallas kernel --------------------------------
def _mlp_discriminator_kernel(x_ref, w1_ref, b1_ref, w2_ref, b2_ref, out_ref,
                              *, c_rows):
    # x streamed as f32; cast to bf16 on the VPU right before the MXU dot.
    x = x_ref[...].astype(jnp.bfloat16)
    # Layer 1: bf16 MXU matmul with f32 accumulation; bias + ReLU in f32 (VPU).
    h = jnp.dot(x, w1_ref[...], preferred_element_type=jnp.float32)
    h = jnp.maximum(h + b1_ref[...], 0.0)            # b1 is (1, Hp): broadcast
    # Layer 2: bf16 MXU matmul, f32 accumulation; raw logits.
    o = jnp.dot(h.astype(jnp.bfloat16), w2_ref[...],
                preferred_element_type=jnp.float32)
    o = o + b2_ref[...]                              # (TB, Cp) f32 logits
    # Compact, lane-dense writeback: XLU-transpose the tile and store only the
    # first c_rows (= round_up(C, 8)) sublanes -> out block is (c_rows, TB).
    out_ref[...] = o.T[:c_rows, :]


# ------------------------------- Wrapper -------------------------------------
@functools.partial(jax.jit, static_argnames=("num_classes", "block_batch"))
def discriminator_forward(x, w1p, b1p, w2p, b2p, *, num_classes,
                          block_batch: int = 1024):
    """Fused two-layer MLP discriminator.

    x: [B, D] f32 (unpadded).  w1p/b1p/w2p/b2p are the pre-padded, pre-cast
    parameters produced once in MultiClassDiscriminator.__init__.
    Returns logits [B, num_classes] f32.
    """
    B, D = x.shape
    _, Hp = w1p.shape
    _, Cp = w2p.shape
    C = num_classes
    Cr = _round_up(C, 8)                      # compact output rows (sublanes)

    TB, grid_b = _batch_tiling(B, block_batch)

    cost = pl.CostEstimate(
        flops=2 * B * (D * Hp + Hp * Cp),
        transcendentals=0,
        bytes_accessed=(B * D * 4 + Cr * B * 4
                        + (w1p.size + w2p.size) * 2
                        + (b1p.size + b2p.size) * 4),
    )

    kernel = functools.partial(_mlp_discriminator_kernel, c_rows=Cr)

    out_t = pl.pallas_call(
        kernel,
        out_shape=jax.ShapeDtypeStruct((Cr, B), jnp.float32),
        grid=(grid_b,),
        in_specs=[
            pl.BlockSpec((TB, D), lambda i: (i, 0)),    # x: streamed, f32, unpadded
            pl.BlockSpec((D, Hp), lambda i: (0, 0)),    # w1: resident bf16
            pl.BlockSpec((1, Hp), lambda i: (0, 0)),    # b1: resident f32
            pl.BlockSpec((Hp, Cp), lambda i: (0, 0)),   # w2: resident bf16
            pl.BlockSpec((1, Cp), lambda i: (0, 0)),    # b2: resident f32
        ],
        out_specs=pl.BlockSpec((Cr, TB), lambda i: (0, i)),  # compact, lane-dense
        compiler_params=pltpu.CompilerParams(
            dimension_semantics=("parallel",)),
        cost_estimate=cost,
    )(x, w1p, b1p, w2p, b2p)

    # Compact (Cr, B) slab -> (B, C) logits; touches ~16x less data than the
    # old (B, 128) f32 slab slice.
    return out_t[:C, :].T


# --------------------------- Module equivalent -------------------------------
class MultiClassDiscriminator:
    """JAX/Pallas port of d_mmvae.Models.MultiClassDiscriminator.

    `layers` is realized as a fixed Linear->ReLU->Linear stack executed inside
    a single batch-tiled Pallas TPU kernel.  Parameters are padded to
    lane-friendly shapes and cast to bf16 ONCE here (hoisted out of the
    per-call path).  `labels` / `get_label` match the PyTorch semantics.
    """
    # TODO(synk): arbitrary nn.Sequential stacks would need a kernel per layer
    # pattern; only the canonical Linear->ReLU->Linear discriminator is fused.

    def __init__(self, params, classes, block_batch: int = 1024):
        w1, b1, w2, b2 = params
        D, H = w1.shape
        _, C = w2.shape
        Hp = _round_up(H, 128)
        Cp = _round_up(C, 128)
        self.num_classes = C
        self.block_batch = block_batch
        # Pre-pad + pre-cast once.  Zero padding is exact for the retained
        # [:B, :C] logits (padded hidden columns are ReLU(0)=0 and padded w2
        # rows/cols are 0).  D (contraction dim) is left unpadded so it matches
        # the unpadded x blocks.
        self.w1p = jnp.zeros((D, Hp), jnp.bfloat16).at[:, :H].set(
            w1.astype(jnp.bfloat16))
        self.b1p = jnp.zeros((1, Hp), jnp.float32).at[0, :H].set(
            b1.astype(jnp.float32))
        self.w2p = jnp.zeros((Hp, Cp), jnp.bfloat16).at[:H, :C].set(
            w2.astype(jnp.bfloat16))
        self.b2p = jnp.zeros((1, Cp), jnp.float32).at[0, :C].set(
            b2.astype(jnp.float32))
        self.labels = jnp.eye(len(classes), dtype=jnp.float32)
        self.classes = {label: i for i, label in enumerate(classes)}

    def forward(self, x):
        return discriminator_forward(x, self.w1p, self.b1p, self.w2p, self.b2p,
                                      num_classes=self.num_classes,
                                      block_batch=self.block_batch)

    def __call__(self, x):
        return self.forward(x)

    def get_label(self, key):
        return self.labels[self.classes[key]]


# --------------------------------- Main --------------------------------------
if __name__ == "__main__":
    # Shapes implied by the module's use in MMVAE: shared-latent points in,
    # one logit per expert out.  batch=256 exercises the multi-tile grid
    # (TB=128, grid=2 -> both v7x TensorCores); a second call with batch=16
    # exercises the single-tile path.
    batch = 256
    latent_dim = 32
    hidden = 64
    classes = ["expert_a", "expert_b", "expert_c"]
    num_classes = len(classes)

    key = jax.random.PRNGKey(0)
    kx, k1, k2, k3, k4 = jax.random.split(key, 5)

    x = jax.random.normal(kx, (batch, latent_dim), dtype=jnp.float32)
    w1 = jax.random.normal(k1, (latent_dim, hidden), dtype=jnp.float32) * 0.1
    b1 = jax.random.normal(k2, (hidden,), dtype=jnp.float32) * 0.1
    w2 = jax.random.normal(k3, (hidden, num_classes), dtype=jnp.float32) * 0.1
    b2 = jax.random.normal(k4, (num_classes,), dtype=jnp.float32) * 0.1

    disc = MultiClassDiscriminator((w1, b1, w2, b2), classes, block_batch=1024)

    logits = jax.block_until_ready(disc(x))
    assert logits.shape == (batch, num_classes)

    # Reference matching the kernel's numerics (bf16 operands, f32 accumulate).
    xb = x.astype(jnp.bfloat16)
    w1b = w1.astype(jnp.bfloat16)
    w2b = w2.astype(jnp.bfloat16)
    h_ref = jnp.maximum(
        jnp.dot(xb, w1b, preferred_element_type=jnp.float32) + b1, 0.0)
    ref = jnp.dot(h_ref.astype(jnp.bfloat16), w2b,
                  preferred_element_type=jnp.float32) + b2
    assert jnp.allclose(logits, ref, atol=2e-3, rtol=2e-3), "mismatch vs bf16 reference"

    # Loose sanity check against strict f32 math (documents the intentional
    # bf16 operand rounding vs the f32 PyTorch module).
    ref_f32 = jnp.maximum(x @ w1 + b1, 0.0) @ w2 + b2
    assert jnp.allclose(logits, ref_f32, atol=5e-2, rtol=5e-2), "mismatch vs f32 reference"

    # Single-tile (grid == 1) path.
    small = jax.block_until_ready(disc(x[:16]))
    assert small.shape == (16, num_classes)
    assert jnp.allclose(small, logits[:16], atol=1e-5, rtol=1e-5), "tiling-dependent result"

    # Exercise the label bookkeeping path too.
    lbl = disc.get_label("expert_b")
    assert jnp.allclose(lbl, jnp.array([0.0, 1.0, 0.0]))

    print("KERNEL_OK")
</pallas_src>

<mosaic_0001>
module attributes {stable_mosaic.version = 11 : i64} {
  func.func @_mlp_discriminator_kernel(%arg0: i32, %arg1: memref<128x32xf32, #tpu.memory_space<vmem>>, %arg2: memref<32x128xbf16, #tpu.memory_space<vmem>>, %arg3: memref<1x128xf32, #tpu.memory_space<vmem>>, %arg4: memref<128x128xbf16, #tpu.memory_space<vmem>>, %arg5: memref<1x128xf32, #tpu.memory_space<vmem>>, %arg6: memref<8x128xf32, #tpu.memory_space<vmem>>) attributes {dimension_semantics = [#tpu.dimension_semantics<parallel>], iteration_bounds = array<i64: 2>, scalar_prefetch = 0 : i64, scratch_operands = 0 : i64, tpu.core_type = #tpu.core_type<tc>, window_params = [{transform_indices = @transform_0, window_bounds = array<i64: 128, 32>}, {pipeline_mode = #tpu.pipeline_mode<synchronous>, transform_indices = @transform_1, window_bounds = array<i64: 32, 128>}, {pipeline_mode = #tpu.pipeline_mode<synchronous>, transform_indices = @transform_2, window_bounds = array<i64: 1, 128>}, {pipeline_mode = #tpu.pipeline_mode<synchronous>, transform_indices = @transform_3, window_bounds = array<i64: 128, 128>}, {pipeline_mode = #tpu.pipeline_mode<synchronous>, transform_indices = @transform_4, window_bounds = array<i64: 1, 128>}, {transform_indices = @transform_5, window_bounds = array<i64: 8, 128>}]} {
    %c0 = arith.constant 0 : index
    %c0_0 = arith.constant 0 : index
    %0 = vector.load %arg1[%c0, %c0_0] : memref<128x32xf32, #tpu.memory_space<vmem>>, vector<128x32xf32>
    %1 = arith.truncf %0 : vector<128x32xf32> to vector<128x32xbf16>
    %c0_1 = arith.constant 0 : index
    %c0_2 = arith.constant 0 : index
    %2 = vector.load %arg2[%c0_1, %c0_2] : memref<32x128xbf16, #tpu.memory_space<vmem>>, vector<32x128xbf16>
    %cst = arith.constant dense<0.000000e+00> : vector<128x128xf32>
    %3 = tpu.matmul %1, %2, %cst {dimension_numbers = #tpu.dot_dimension_numbers<[1], [0], [0], [1], [0, 0, 1, 1], [], []>} : vector<128x32xbf16>, vector<32x128xbf16>, vector<128x128xf32> -> vector<128x128xf32>
    %c0_3 = arith.constant 0 : index
    %c0_4 = arith.constant 0 : index
    %4 = vector.load %arg3[%c0_3, %c0_4] : memref<1x128xf32, #tpu.memory_space<vmem>>, vector<1x128xf32>
    %5 = vector.broadcast %4 : vector<1x128xf32> to vector<128x128xf32>
    %6 = arith.addf %3, %5 : vector<128x128xf32>
    %cst_5 = arith.constant 0.000000e+00 : f32
    %7 = vector.broadcast %cst_5 : f32 to vector<128x128xf32>
    %8 = arith.maximumf %6, %7 : vector<128x128xf32>
    %9 = arith.truncf %8 : vector<128x128xf32> to vector<128x128xbf16>
    %c0_6 = arith.constant 0 : index
    %c0_7 = arith.constant 0 : index
    %10 = vector.load %arg4[%c0_6, %c0_7] : memref<128x128xbf16, #tpu.memory_space<vmem>>, vector<128x128xbf16>
    %cst_8 = arith.constant dense<0.000000e+00> : vector<128x128xf32>
    %11 = tpu.matmul %9, %10, %cst_8 {dimension_numbers = #tpu.dot_dimension_numbers<[1], [0], [0], [1], [0, 0, 1, 1], [], []>} : vector<128x128xbf16>, vector<128x128xbf16>, vector<128x128xf32> -> vector<128x128xf32>
    %c0_9 = arith.constant 0 : index
    %c0_10 = arith.constant 0 : index
    %12 = vector.load %arg5[%c0_9, %c0_10] : memref<1x128xf32, #tpu.memory_space<vmem>>, vector<1x128xf32>
    %13 = vector.broadcast %12 : vector<1x128xf32> to vector<128x128xf32>
    %14 = arith.addf %11, %13 : vector<128x128xf32>
    %15 = tpu.transpose %14, [1, 0] : vector<128x128xf32> -> vector<128x128xf32>
    %16 = vector.extract_strided_slice %15 {offsets = [0, 0], sizes = [8, 128], strides = [1, 1]} : vector<128x128xf32> to vector<8x128xf32>
    %c0_11 = arith.constant 0 : index
    %c0_12 = arith.constant 0 : index
    %17 = vector.load %arg6[%c0_11, %c0_12] : memref<8x128xf32, #tpu.memory_space<vmem>>, vector<8x128xf32>
    tpu.vector_store %arg6[%c0_11, %c0_12], %16 {strides = array<i32>} : memref<8x128xf32, #tpu.memory_space<vmem>>, vector<8x128xf32>,
    return
  }
  func.func @transform_0(%arg0: i32) -> (i32, i32) {
    %c0_i32 = arith.constant 0 : i32
    %c0_i32_0 = arith.constant 0 : i32
    return %arg0, %c0_i32 : i32, i32
  }
  func.func @transform_1(%arg0: i32) -> (i32, i32) {
    %c0_i32 = arith.constant 0 : i32
    %c0_i32_0 = arith.constant 0 : i32
    %c0_i32_1 = arith.constant 0 : i32
    return %c0_i32, %c0_i32_0 : i32, i32
  }
  func.func @transform_2(%arg0: i32) -> (i32, i32) {
    %c0_i32 = arith.constant 0 : i32
    %c0_i32_0 = arith.constant 0 : i32
    %c0_i32_1 = arith.constant 0 : i32
    return %c0_i32, %c0_i32_0 : i32, i32
  }
  func.func @transform_3(%arg0: i32) -> (i32, i32) {
    %c0_i32 = arith.constant 0 : i32
    %c0_i32_0 = arith.constant 0 : i32
    %c0_i32_1 = arith.constant 0 : i32
    return %c0_i32, %c0_i32_0 : i32, i32
  }
  func.func @transform_4(%arg0: i32) -> (i32, i32) {
    %c0_i32 = arith.constant 0 : i32
    %c0_i32_0 = arith.constant 0 : i32
    %c0_i32_1 = arith.constant 0 : i32
    return %c0_i32, %c0_i32_0 : i32, i32
  }
  func.func @transform_5(%arg0: i32) -> (i32, i32) {
    %c0_i32 = arith.constant 0 : i32
    %c0_i32_0 = arith.constant 0 : i32
    return %c0_i32, %arg0 : i32, i32
  }
}

</mosaic_0001>

<bundles_post_ra>
// kernel: discriminator_forward.1
= control target key start
LH: loop header
LB: loop body
LE: loop exit
PB: predicated region body
PF: predicated region fallthrough
CT: control target
= control target key end

     0   :  { %s853_s18 = smov 0   ;;  %s937_s0 = inlined_call_operand.vmem [shape: f32[256,32], index: 0, kind: input, shape index: {}]   ;;  %s938_s1 = inlined_call_operand.vmem [shape: bf16[32,128], index: 1, kind: input, shape index: {}]   ;;  %s939_s2 = inlined_call_operand.vmem [shape: f32[1,128], index: 2, kind: input, shape index: {}]   ;;  %s940_s3 = inlined_call_operand.vmem [shape: bf16[128,128], index: 3, kind: input, shape index: {}]   ;;  %s941_s4 = inlined_call_operand.vmem [shape: f32[1,128], index: 4, kind: input, shape index: {}]   ;;  %s942_s5 = inlined_call_operand.vmem [shape: f32[8,256], index: 5, kind: output, shape index: {}]  }
   0x1 LB: > { %s859_s19 = sadd.s32 4294967295, %s821_s18   ;;  %p677_p0 = scmp.ge.s32.totalorder %s821_s18, 1  ;;  %s821_s18 = sphi %s853_s18, %s15_s18  }
   0x2   : > { %p188_p1 = scmp.lt.s32.totalorder %s821_s18, 3 }
   0x4   : > { %p189_p2 = pnand %p677_p0, %p188_p1 }
   0x5   : > { %v805_v0 = vld [vmem:[%s938_s1] sm:$0xff] (!%p189_p2)   ;;  %s678_s22 = sshll.u32 (!%p189_p2), %s859_s19, 4  ;;  %v806_v1 = vld [vmem:[%s938_s1 + $0x8] sm:$0xff] (!%p189_p2)   ;;  %v809_v4 = vld [vmem:[%s940_s3 + $0x10] sm:$0xff] (!%p189_p2)   ;;  %vm273_vm0 = vcmask (!%p189_p2), 261120   ;;  %p221_p4 = scmp.lt.s32.totalorder (!%p189_p2), %s859_s19, 1 }
   0x6   : > { %192 = sbr.rel (%p189_p2) target bundleno = 587 (0x24b), region = 40  ;;  %p216_p3 = scmp.lt.s32.totalorder (!%p189_p2), %s678_s22, 31  ;;  %729 = vmatprep.subr.bf16.mxu0 (!%p189_p2), %v805_v0  ;;  %v807_v2 = vld [vmem:[%s940_s3] sm:$0xff] (!%p189_p2)   ;;  %v808_v3 = vld [vmem:[%s940_s3 + $0x8] sm:$0xff] (!%p189_p2)   ;;  %v810_v16 = vld [vmem:[%s940_s3 + $0x18] sm:$0xff] (!%p189_p2)  }
   0x7   : > { %730 = vmatpush3.bf16.msra.mxu0 (!%p189_p2), %v805_v0  ;;  %781 = vmatprep.subr.bf16.mxu1 (!%p189_p2), %v807_v2  ;;  %v811_v21 = vld [vmem:[%s940_s3 + $0x20] sm:$0xff] (!%p189_p2)   ;;  %v812_v24 = vld [vmem:[%s940_s3 + $0x28] sm:$0xff] (!%p189_p2)   ;;  %v813_v32 = vld [vmem:[%s940_s3 + $0x30] sm:$0xff] (!%p189_p2)  }
   0x8   : > { %731 = vmatprep.subr.bf16.mxu0 (!%p189_p2), %v806_v1  ;;  %789 = vmatpush3.bf16.msra.mxu1 (!%p189_p2), %v807_v2  ;;  %v814_v33 = vld [vmem:[%s940_s3 + $0x38] sm:$0xff] (!%p189_p2)   ;;  %v681_v34 = vld [vmem:[%s939_s2] ss:$0 sm:$0xff] (!%p189_p2) }
   0x9   : > { %782 = vmatprep.subr.bf16.mxu1 (!%p189_p2), %v808_v3 }
   0xb   : > { %732 = vmatpush3.bf16.msra.mxu0 (!%p189_p2), %v806_v1 }
   0xc   : > { %749 = vmatprep.subr.bf16.mxu0 (!%p189_p2), %v807_v2  ;;  %790 = vmatpush3.bf16.msra.mxu1 (!%p189_p2), %v808_v3 }
   0xd   : > { %s944_s22 = smov (!%p216_p3, %s678_s22), 31  ;;  %783 = vmatprep.subr.bf16.mxu1 %v809_v4  ;;  %s946_s19 = smov (!%p221_p4, %s859_s19), 1 }
   0xe   : > { %s679_s29 = sshll.u32 %s944_s22, 3  ;;  %s680_s26 = sshll.u32 %s946_s19, 3 }
   0xf   : > { %s879_s7 = scalar_lea.vmem %s937_s0, %s679_s29  ;;  %s224_s29 = scalar_lea.vmem %s942_s5, %s680_s26 }
  0x10   : > { %v226_v5 = vld [vmem:[%s879_s7] sm:$0xff]  ;;  %v227_v6 = vld [vmem:[%s879_s7 + $0x8] sm:$0xff]  ;;  %v228_v7 = vld [vmem:[%s879_s7 + $0x10] sm:$0xff]  ;;  %791 = vmatpush3.bf16.msra.mxu1 %v809_v4 }
  0x11   : > { %v242_v8 = vpack.c.bf16 %v227_v6, %v226_v5  ;;  %v229_v9 = vld [vmem:[%s879_s7 + $0x18] sm:$0xff]  ;;  %v230_v10 = vld [vmem:[%s879_s7 + $0x20] sm:$0xff]  ;;  %v231_v11 = vld [vmem:[%s879_s7 + $0x28] sm:$0xff]  ;;  %784 = vmatprep.subr.bf16.mxu1 %v810_v16 }
  0x12   : > { %v243_v12 = vpack.c.bf16 %v229_v9, %v228_v7  ;;  %v244_v13 = vpack.c.bf16 %v231_v11, %v230_v10  ;;  %v232_v14 = vld [vmem:[%s879_s7 + $0x30] sm:$0xff]  ;;  %v233_v15 = vld [vmem:[%s879_s7 + $0x38] sm:$0xff]  ;;  %v234_v17 = vld [vmem:[%s879_s7 + $0x40] sm:$0xff] }
  0x13   : > { %733 = vmatprep.mubr.msk.bf16.mxu0 %vm273_vm0, %v242_v8  ;;  %v235_v18 = vld [vmem:[%s879_s7 + $0x48] sm:$0xff]  ;;  %v245_v19 = vpack.c.bf16 %v233_v15, %v232_v14  ;;  %v236_v22 = vld [vmem:[%s879_s7 + $0x50] sm:$0xff]  ;;  %v237_v23 = vld [vmem:[%s879_s7 + $0x58] sm:$0xff] }
  0x14   : > { %734 = vmatmul.mubr.msk.bf16.vlgmr.msra.gmra.mrb[0].mxu0 %vm273_vm0, %v243_v12  ;;  %v246_v20 = vpack.c.bf16 %v235_v18, %v234_v17  ;;  %792 = vmatpush3.bf16.msra.mxu1 %v810_v16  ;;  %v238_v25 = vld [vmem:[%s879_s7 + $0x60] sm:$0xff]  ;;  %v239_v26 = vld [vmem:[%s879_s7 + $0x68] sm:$0xff]  ;;  %v247_v27 = vpack.c.bf16 %v237_v23, %v236_v22  ;;  %v240_v29 = vld [vmem:[%s879_s7 + $0x70] sm:$0xff] }
  0x15   : > { %737 = vmatprep.mubr.msk.bf16.mxu0 %vm273_vm0, %v244_v13  ;;  %750 = vmatpush3.bf16.msra.mxu0 %v807_v2  ;;  %v248_v28 = vpack.c.bf16 %v239_v26, %v238_v25  ;;  %v241_v30 = vld [vmem:[%s879_s7 + $0x78] sm:$0xff] }
  0x16   : > { %751 = vmatprep.subr.bf16.mxu0 %v808_v3  ;;  %785 = vmatprep.subr.bf16.mxu1 %v811_v21  ;;  %v249_v31 = vpack.c.bf16 %v241_v30, %v240_v29 }
  0x18   : > { %793 = vmatpush3.bf16.msra.mxu1 %v811_v21 }
  0x19   : > { %752 = vmatpush3.bf16.msra.mxu0 %v808_v3  ;;  %786 = vmatprep.subr.bf16.mxu1 %v812_v24 }
  0x1a   : > { %753 = vmatprep.subr.bf16.mxu0 %v809_v4 }
  0x1c   : > { %738 = vmatmul.mubr.msk.bf16.gmra.mrb[4].mxu0 %vm273_vm0, %v245_v19  ;;  %794 = vmatpush3.bf16.msra.mxu1 %v812_v24 }
  0x1d   : > { %741 = vmatprep.mubr.msk.bf16.mxu0 %vm273_vm0, %v246_v20  ;;  %754 = vmatpush3.bf16.msra.mxu0 %v809_v4 }
  0x1e   : > { %755 = vmatprep.subr.bf16.mxu0 %v810_v16  ;;  %787 = vmatprep.subr.bf16.mxu1 %v813_v32 }
  0x20   : > { %795 = vmatpush3.bf16.msra.mxu1 %v813_v32 }
  0x21   : > { %756 = vmatpush3.bf16.msra.mxu0 %v810_v16  ;;  %788 = vmatprep.subr.bf16.mxu1 %v814_v33 }
  0x22   : > { %757 = vmatprep.subr.bf16.mxu0 %v811_v21 }
  0x24   : > { %742 = vmatmul.mubr.msk.bf16.gmra.mrb[8].mxu0 %vm273_vm0, %v247_v27  ;;  %796 = vmatpush3.bf16.msra.mxu1 %v814_v33  ;;  %v692_v27 = vld [vmem:[%s941_s4] ss:$0 sm:$0xff] }
  0x25   : > { %745 = vmatprep.mubr.msk.bf16.mxu0 %vm273_vm0, %v248_v28  ;;  %758 = vmatpush3.bf16.msra.mxu0 %v811_v21 }
  0x26   : > { %759 = vmatprep.subr.bf16.mxu0 %v812_v24 }
  0x29   : > { %760 = vmatpush3.bf16.msra.mxu0 %v812_v24 }
  0x2a   : > { %761 = vmatprep.subr.bf16.mxu0 %v813_v32 }
  0x2c   : > { %746 = vmatmul.mubr.msk.bf16.gmra.mrb[12].mxu0 %vm273_vm0, %v249_v31 }
  0x2d   : > { %762 = vmatpush3.bf16.msra.mxu0 %v813_v32 }
  0x2e   : > { %763 = vmatprep.subr.bf16.mxu0 %v814_v33 }
  0x31   : > { %764 = vmatpush3.bf16.msra.mxu0 %v814_v33 }
  0xe7   : > { %v735_v35 = vpop.f32.mrb[0].mxu0 }
  0xe8   : > { %v341_v36 = vadd.f32 %v735_v35, %v681_v34  ;;  %v332_v37 = vpop.f32.mrb[1].mxu0 }
  0xe9   : > { %v333_v38 = vadd.f32 %v681_v34, %v332_v37  ;;  %v736_v39 = vpop.f32.mrb[2].mxu0 }
  0xea   : > { %v344_v40 = vadd.f32 %v736_v39, %v681_v34  ;;  %v335_v41 = vpop.f32.mrb[3].mxu0  ;;  %v397_v43 = vmax.f32 %v341_v36, 0.0 }
  0xeb   : > { %v336_v42 = vadd.f32 %v681_v34, %v335_v41  ;;  %v395_v45 = vmax.f32 %v333_v38, 0.0 }
  0xec   : > { %v398_v44 = vmax.f32 %v344_v40, 0.0 }
  0xed   : > { %v396_v46 = vmax.f32 %v336_v42, 0.0 }
  0xee   : > { %v412_v47 = vpack.c.bf16 %v398_v44, %v397_v43 }
  0xef   : > { %v411_v48 = vpack.c.bf16 %v396_v46, %v395_v45  ;;  %v739_v49 = vpop.f32.mrb[4].mxu0 }
  0xf0   : > { %v357_v50 = vadd.f32 %v739_v49, %v681_v34  ;;  %v348_v51 = vpop.f32.mrb[5].mxu0 }
  0xf1   : > { %v349_v52 = vadd.f32 %v681_v34, %v348_v51  ;;  %765 = vmatprep.mubr.bf16.mxu0 %v411_v48  ;;  %v740_v53 = vpop.f32.mrb[6].mxu0 }
  0xf2   : > { %v401_v54 = vmax.f32 %v357_v50, 0.0  ;;  %v360_v55 = vadd.f32 %v740_v53, %v681_v34  ;;  %766 = vmatmul.mubr.bf16.vlgmr.msra.gmra.mrb[16].mxu0 %v412_v47  ;;  %v351_v56 = vpop.f32.mrb[7].mxu0 }
  0xf3   : > { %v399_v57 = vmax.f32 %v349_v52, 0.0  ;;  %v352_v58 = vadd.f32 %v681_v34, %v351_v56 }
  0xf4   : > { %v402_v59 = vmax.f32 %v360_v55, 0.0 }
  0xf5   : > { %v400_v60 = vmax.f32 %v352_v58, 0.0 }
  0xf6   : > { %v414_v61 = vpack.c.bf16 %v402_v59, %v401_v54 }
  0xf7   : > { %v413_v62 = vpack.c.bf16 %v400_v60, %v399_v57  ;;  %v743_v63 = vpop.f32.mrb[8].mxu0 }
  0xf8   : > { %v373_v0 = vadd.f32 %v743_v63, %v681_v34  ;;  %v364_v1 = vpop.f32.mrb[9].mxu0 }
  0xf9   : > { %769 = vmatprep.mubr.bf16.mxu1 %v413_v62  ;;  %v365_v2 = vadd.f32 %v681_v34, %v364_v1  ;;  %v744_v3 = vpop.f32.mrb[10].mxu0 }
  0xfa   : > { %770 = vmatmul.mubr.bf16.vlgmr.msra.gmra.mrb[0].mxu1 %v414_v61  ;;  %v405_v4 = vmax.f32 %v373_v0, 0.0  ;;  %v376_v5 = vadd.f32 %v744_v3, %v681_v34  ;;  %v367_v6 = vpop.f32.mrb[11].mxu0 }
  0xfb   : > { %v403_v7 = vmax.f32 %v365_v2, 0.0  ;;  %v368_v8 = vadd.f32 %v681_v34, %v367_v6 }
  0xfc   : > { %v406_v9 = vmax.f32 %v376_v5, 0.0 }
  0xfd   : > { %v404_v10 = vmax.f32 %v368_v8, 0.0 }
  0xfe   : > { %v416_v11 = vpack.c.bf16 %v406_v9, %v405_v4 }
  0xff   : > { %v415_v12 = vpack.c.bf16 %v404_v10, %v403_v7  ;;  %v747_v13 = vpop.f32.mrb[12].mxu0 }
 0x100   : > { %v389_v14 = vadd.f32 %v747_v13, %v681_v34  ;;  %v380_v15 = vpop.f32.mrb[13].mxu0 }
 0x101   : > { %773 = vmatprep.mubr.bf16.mxu1 %v415_v12  ;;  %v381_v16 = vadd.f32 %v681_v34, %v380_v15  ;;  %v748_v17 = vpop.f32.mrb[14].mxu0 }
 0x102   : > { %774 = vmatmul.mubr.bf16.gmra.mrb[4].mxu1 %v416_v11  ;;  %v409_v18 = vmax.f32 %v389_v14, 0.0  ;;  %v392_v19 = vadd.f32 %v748_v17, %v681_v34  ;;  %v383_v20 = vpop.f32.mrb[15].mxu0 }
 0x103   : > { %v407_v21 = vmax.f32 %v381_v16, 0.0  ;;  %v384_v22 = vadd.f32 %v681_v34, %v383_v20 }
 0x104   : > { %v410_v23 = vmax.f32 %v392_v19, 0.0 }
 0x105   : > { %v408_v24 = vmax.f32 %v384_v22, 0.0 }
 0x106   : > { %v418_v25 = vpack.c.bf16 %v410_v23, %v409_v18 }
 0x107   : > { %v417_v26 = vpack.c.bf16 %v408_v24, %v407_v21 }
 0x109   : > { %777 = vmatprep.mubr.bf16.mxu1 %v417_v26 }
 0x10a   : > { %778 = vmatmul.mubr.bf16.gmra.mrb[8].mxu1 %v418_v25 }
 0x1c5   : > { %v767_v28 = vpop.f32.mrb[16].mxu0 }
 0x1c6   : > { %v524_v29 = vpop.f32.mrb[17].mxu0  ;;  %v533_v36 = vadd.f32 %v767_v28, %v692_v27 }
 0x1c7   : > { %v768_v30 = vpop.f32.mrb[18].mxu0  ;;  %v525_v31 = vadd.f32 %v692_v27, %v524_v29 }
 0x1c8   : > { %v527_v32 = vpop.f32.mrb[19].mxu0  ;;  %v536_v39 = vadd.f32 %v768_v30, %v692_v27 }
 0x1c9   : > { %587 = vxpose.xlu0.b32.start [1/16] (narrow) %v525_v31, 8  ;;  %v528_v33 = vadd.f32 %v692_v27, %v527_v32 }
 0x1cd   : > { %588 = vxpose.xlu0.b32.cont [2/16] (narrow) %v528_v33, 8  ;;  %v771_v35 = vpop.f32.mrb[0].mxu1 }
 0x1ce   : > { %v540_v34 = vpop.f32.mrb[1].mxu1  ;;  %v549_v48 = vadd.f32 %v771_v35, %v692_v27 }
 0x1cf   : > { %v772_v37 = vpop.f32.mrb[2].mxu1  ;;  %v541_v42 = vadd.f32 %v692_v27, %v540_v34 }
 0x1d0   : > { %v543_v38 = vpop.f32.mrb[3].mxu1  ;;  %v552_v51 = vadd.f32 %v772_v37, %v692_v27 }
 0x1d1   : > { %589 = vxpose.xlu0.b32.cont [3/16] (narrow) %v533_v36, 8  ;;  %v544_v45 = vadd.f32 %v692_v27, %v543_v38 }
 0x1d5   : > { %590 = vxpose.xlu0.b32.cont [4/16] (narrow) %v536_v39, 8  ;;  %v775_v40 = vpop.f32.mrb[4].mxu1 }
 0x1d6   : > { %v556_v41 = vpop.f32.mrb[5].mxu1  ;;  %v565_v54 = vadd.f32 %v775_v40, %v692_v27 }
 0x1d7   : > { %v776_v43 = vpop.f32.mrb[6].mxu1  ;;  %v557_v52 = vadd.f32 %v692_v27, %v556_v41 }
 0x1d8   : > { %v559_v44 = vpop.f32.mrb[7].mxu1  ;;  %v568_v55 = vadd.f32 %v776_v43, %v692_v27 }
 0x1d9   : > { %591 = vxpose.xlu0.b32.cont [5/16] (narrow) %v541_v42, 8  ;;  %v560_v53 = vadd.f32 %v692_v27, %v559_v44 }
 0x1dd   : > { %592 = vxpose.xlu0.b32.cont [6/16] (narrow) %v544_v45, 8  ;;  %v779_v46 = vpop.f32.mrb[8].mxu1 }
 0x1de   : > { %v572_v47 = vpop.f32.mrb[9].mxu1  ;;  %v581_v58 = vadd.f32 %v779_v46, %v692_v27 }
 0x1df   : > { %v780_v49 = vpop.f32.mrb[10].mxu1  ;;  %v573_v56 = vadd.f32 %v692_v27, %v572_v47 }
 0x1e0   : > { %v575_v50 = vpop.f32.mrb[11].mxu1  ;;  %v584_v59 = vadd.f32 %v780_v49, %v692_v27 }
 0x1e1   : > { %593 = vxpose.xlu0.b32.cont [7/16] (narrow) %v549_v48, 8  ;;  %v576_v57 = vadd.f32 %v692_v27, %v575_v50 }
 0x1e5   : > { %594 = vxpose.xlu0.b32.cont [8/16] (narrow) %v552_v51, 8 }
 0x1e9   : > { %595 = vxpose.xlu0.b32.cont [9/16] (narrow) %v557_v52, 8 }
 0x1ed   : > { %596 = vxpose.xlu0.b32.cont [10/16] (narrow) %v560_v53, 8 }
 0x1f1   : > { %597 = vxpose.xlu0.b32.cont [11/16] (narrow) %v565_v54, 8 }
 0x1f5   : > { %598 = vxpose.xlu0.b32.cont [12/16] (narrow) %v568_v55, 8 }
 0x1f9   : > { %599 = vxpose.xlu0.b32.cont [13/16] (narrow) %v573_v56, 8 }
 0x1fd   : > { %600 = vxpose.xlu0.b32.cont [14/16] (narrow) %v576_v57, 8 }
 0x201   : > { %601 = vxpose.xlu0.b32.cont [15/16] (narrow) %v581_v58, 8 }
 0x205   : > { %602 = vxpose.xlu0.b32.end [16/16] (narrow) %v584_v59, 8 }
 0x249   : > { %v603_v60 = vpop.trf.xlu0 }
 0x24a   : > { %619 = vst [vmem:[%s224_s29] sm:$0xff] %v603_v60 }
 0x24b PF: > { %s15_s18 = sadd.s32 1, %s821_s18  }
 0x24c   : > { %p12_p5 = scmp.ge.s32.totalorder %s15_s18, 4  }
 0x24e   :  { %14 = sbr.rel (!%p12_p5) target bundleno = 1 (0x1), region = 70 }

</bundles_post_ra>
